<compile_context>
chip_gen: v7x
topology: tpu7x:2x2x1
jax: 0.10.0
libtpu: 0.0.40
codegen_flags: <defaults>
</compile_context>

<pallas_src>
import jax
import jax.numpy as jnp
from jax.experimental import pallas as pl
from jax.experimental.pallas import tpu as pltpu


def _round_up(x: int, m: int) -> int:
    return ((x + m - 1) // m) * m


def _mlp_kernel(x_ref, w1_ref, b1_ref, w2_ref, b2_ref, w3_ref, b3_ref, o_ref):
    # One batch tile per grid step; whole hot path (3 layers + bias + ReLU)
    # fused, intermediates never leave VMEM/vregs.
    x = x_ref[...]
    tb = x.shape[0]
    in_features = x.shape[1]
    b1 = b1_ref[...]

    if in_features <= 8:
        # K is tiny: an MXU contraction would use <= 8/128 of its depth and
        # cost ~TB/8 vmatmul pushes; do it instead as `in_features`
        # broadcast-FMAs on the otherwise-idle VPU (exact f32 math).
        w1 = w1_ref[...].astype(jnp.float32)
        h1 = jnp.broadcast_to(b1, (tb, w1.shape[1]))
        for k in range(in_features):
            h1 = h1 + x[:, k:k + 1].astype(jnp.float32) * w1[k:k + 1, :]
    else:
        h1 = jnp.dot(x.astype(w1_ref.dtype), w1_ref[...],
                     preferred_element_type=jnp.float32) + b1
    h1 = jnp.maximum(h1, 0.0)                        # F.relu

    h2 = jnp.dot(h1.astype(w2_ref.dtype), w2_ref[...],
                 preferred_element_type=jnp.float32) + b2_ref[...]
    h2 = jnp.maximum(h2, 0.0)                        # F.relu

    out = jnp.dot(h2.astype(w3_ref.dtype), w3_ref[...],
                  preferred_element_type=jnp.float32) + b3_ref[...]
    # TODO(synk): out_features=4 is lane-sparse (masked vst into a 128-lane
    # padded tile); fuse the downstream consumer into this kernel or repack a
    # lane-dense output slab once matmul cost shrinks enough for the store
    # path to become the bottleneck (v5e first: only 1 vst slot).
    o_ref[...] = out.astype(o_ref.dtype)


def mlp_forward(inputs, params, context=None, batch_tile: int = 2048,
                matmul_dtype=jnp.float32):
    """Pallas-backed MLP forward.

    `params` = dict of (W, b) per layer, already stored kernel-layout:
    W is (in_features, out_features), b is (1, out_features)  (see init_params).

    batch_tile: 2048 is a good default on v5e / v6e / v7x alike — VMEM use at
    these feature sizes is only a few hundred KiB per buffered block, nowhere
    near any scoped-VMEM limit, and larger tiles amortize the ~0.35 us
    per-grid-step pipeline overhead. The tile is also capped at ceil(batch/2)
    (rounded to 8) so the parallel grid has >= 2 steps for v7x's two TCs.

    matmul_dtype: pass jnp.bfloat16 to run the MXU contractions with bf16
    operands (f32 accumulation) — ~3x fewer MXU passes; numerics loosen to
    bf16-level error.
    """
    # TODO(synk): if the context path is ever used for real, pass context as a
    # second kernel input and do x@Wx + c@Wc (split weight) inside the kernel
    # instead of materializing a concatenated copy here.
    x = inputs if context is None else jnp.concatenate([inputs, context], axis=1)

    (w1, b1), (w2, b2), (w3, b3) = params["l1"], params["l2"], params["l3"]

    batch, in_features = x.shape
    out_features = w3.shape[1]

    # Optional reduced-precision MXU operands; biases stay f32, accumulation
    # stays f32 via preferred_element_type inside the kernel.
    if matmul_dtype != jnp.float32:
        w1 = w1.astype(matmul_dtype)
        w2 = w2.astype(matmul_dtype)
        w3 = w3.astype(matmul_dtype)

    # Batch tile: multiple of 8 (sublane constraint), capped by batch_tile and
    # by ceil(batch/2) so the parallel axis has >= 2 steps when possible.
    tb = max(8, min(_round_up(batch_tile, 8), _round_up(pl.cdiv(batch, 2), 8)))
    grid = (pl.cdiv(batch, tb),)

    # x / out tiled over batch (ragged last block is masked by Pallas; safe
    # because rows are independent — do NOT add cross-row reductions without
    # re-adding explicit masking). Weights & biases are full-array blocks with
    # a constant index_map so they stay VMEM-resident across grid steps.
    x_spec = pl.BlockSpec((tb, in_features), lambda i: (i, 0))
    o_spec = pl.BlockSpec((tb, out_features), lambda i: (i, 0))

    def _const_spec(arr):
        nd = arr.ndim
        return pl.BlockSpec(arr.shape, lambda i, _nd=nd: (0,) * _nd)

    out = pl.pallas_call(
        _mlp_kernel,
        out_shape=jax.ShapeDtypeStruct((batch, out_features), inputs.dtype),
        grid=grid,
        in_specs=[
            x_spec,
            _const_spec(w1), _const_spec(b1),
            _const_spec(w2), _const_spec(b2),
            _const_spec(w3), _const_spec(b3),
        ],
        out_specs=o_spec,
        compiler_params=pltpu.CompilerParams(
            dimension_semantics=("parallel",),
        ),
    )(x, w1, b1, w2, b2, w3, b3)

    return out


def init_params(key, in_shape, hidden_sizes, out_shape, context_features=0):
    """Deterministic PyTorch-Linear-style init (uniform +- 1/sqrt(fan_in)).

    Weights are stored ONCE in kernel layout: (in_features, out_features),
    biases as (1, out_features), so the forward wrapper does no per-call
    transposes/reshapes.
    """
    sizes = []
    prev = in_shape + context_features if context_features else in_shape
    for h in hidden_sizes:
        sizes.append((prev, h))
        prev = h
    sizes.append((prev, out_shape))

    params = {}
    names = ["l1", "l2", "l3"]
    for name, (fan_in, fan_out) in zip(names, sizes):
        key, kw, kb = jax.random.split(key, 3)
        bound = 1.0 / jnp.sqrt(jnp.float32(fan_in))
        w = jax.random.uniform(kw, (fan_out, fan_in), jnp.float32, -bound, bound)
        b = jax.random.uniform(kb, (fan_out,), jnp.float32, -bound, bound)
        params[name] = (w.T, b[None, :])   # (in, out), (1, out)
    return params


def mlp_reference(inputs, params, context=None):
    x = inputs if context is None else jnp.concatenate([inputs, context], axis=1)
    (w1, b1), (w2, b2), (w3, b3) = params["l1"], params["l2"], params["l3"]
    x = jnp.maximum(x @ w1 + b1, 0.0)
    x = jnp.maximum(x @ w2 + b2, 0.0)
    return x @ w3 + b3


# TODO(synk): batch_norm=True and dropout_probability>0 (training mode) are not
# exercised by this config; they would need running-stats / RNG plumbing.
# TODO(synk): at in=4/hidden=32/out=4 the MXU width is still mostly idle; real
# throughput requires stacking many such small MLPs (block-diag / batched 3-D
# weights) into one call so one weight load covers 128/256 output lanes.

if __name__ == "__main__":
    key = jax.random.PRNGKey(0)
    k_in, k_in2, k_params = jax.random.split(key, 3)

    in_shape, out_shape = 4, 4
    hidden_sizes = [32, 32]

    params = init_params(k_params, in_shape, hidden_sizes, out_shape,
                         context_features=0)

    # Small case (single grid step, tb == batch == 8).
    batch = 8
    x = jax.random.normal(k_in, (batch, in_shape), dtype=jnp.float32)
    out = jax.block_until_ready(mlp_forward(x, params))
    ref = mlp_reference(x, params)
    assert out.shape == (batch, out_shape)
    assert jnp.allclose(out, ref, atol=1e-5, rtol=1e-5), "mismatch (small batch)"

    # Larger, non-tile-divisible case: multi-step parallel grid with a ragged
    # (masked) last block — no wrapper-side pad/slice.
    batch2 = 300
    x2 = jax.random.normal(k_in2, (batch2, in_shape), dtype=jnp.float32)
    out2 = jax.block_until_ready(mlp_forward(x2, params, batch_tile=128))
    ref2 = mlp_reference(x2, params)
    assert out2.shape == (batch2, out_shape)
    assert jnp.allclose(out2, ref2, atol=1e-5, rtol=1e-5), "mismatch (batch grid)"

    # bf16 MXU-operand path for layers 2/3 (f32 accumulation); bf16 numerics
    # need a looser tolerance than the f32 path.
    out3 = jax.block_until_ready(
        mlp_forward(x2, params, batch_tile=128, matmul_dtype=jnp.bfloat16))
    assert out3.shape == (batch2, out_shape)
    assert jnp.allclose(out3, ref2, atol=5e-2, rtol=5e-2), "mismatch (bf16 path)"

    print("KERNEL_OK")
</pallas_src>

<mosaic_0001>
module attributes {stable_mosaic.version = 11 : i64} {
  func.func @_mlp_kernel(%arg0: i32, %arg1: memref<8x4xf32, #tpu.memory_space<vmem>>, %arg2: memref<4x32xf32, #tpu.memory_space<vmem>>, %arg3: memref<1x32xf32, #tpu.memory_space<vmem>>, %arg4: memref<32x32xf32, #tpu.memory_space<vmem>>, %arg5: memref<1x32xf32, #tpu.memory_space<vmem>>, %arg6: memref<32x4xf32, #tpu.memory_space<vmem>>, %arg7: memref<1x4xf32, #tpu.memory_space<vmem>>, %arg8: memref<8x4xf32, #tpu.memory_space<vmem>>) attributes {dimension_semantics = [#tpu.dimension_semantics<parallel>], iteration_bounds = array<i64: 1>, scalar_prefetch = 0 : i64, scratch_operands = 0 : i64, tpu.core_type = #tpu.core_type<tc>, window_params = [{transform_indices = @transform_0, window_bounds = array<i64: 8, 4>}, {pipeline_mode = #tpu.pipeline_mode<synchronous>, transform_indices = @transform_1, window_bounds = array<i64: 4, 32>}, {pipeline_mode = #tpu.pipeline_mode<synchronous>, transform_indices = @transform_2, window_bounds = array<i64: 1, 32>}, {pipeline_mode = #tpu.pipeline_mode<synchronous>, transform_indices = @transform_3, window_bounds = array<i64: 32, 32>}, {pipeline_mode = #tpu.pipeline_mode<synchronous>, transform_indices = @transform_4, window_bounds = array<i64: 1, 32>}, {pipeline_mode = #tpu.pipeline_mode<synchronous>, transform_indices = @transform_5, window_bounds = array<i64: 32, 4>}, {pipeline_mode = #tpu.pipeline_mode<synchronous>, transform_indices = @transform_6, window_bounds = array<i64: 1, 4>}, {transform_indices = @transform_7, window_bounds = array<i64: 8, 4>}]} {
    %c0 = arith.constant 0 : index
    %c0_0 = arith.constant 0 : index
    %0 = vector.load %arg1[%c0, %c0_0] : memref<8x4xf32, #tpu.memory_space<vmem>>, vector<8x4xf32>
    %c0_1 = arith.constant 0 : index
    %c0_2 = arith.constant 0 : index
    %1 = vector.load %arg3[%c0_1, %c0_2] : memref<1x32xf32, #tpu.memory_space<vmem>>, vector<1x32xf32>
    %c0_3 = arith.constant 0 : index
    %c0_4 = arith.constant 0 : index
    %2 = vector.load %arg2[%c0_3, %c0_4] : memref<4x32xf32, #tpu.memory_space<vmem>>, vector<4x32xf32>
    %3 = vector.shape_cast %1 : vector<1x32xf32> to vector<1x32xf32>
    %4 = vector.broadcast %3 : vector<1x32xf32> to vector<8x32xf32>
    %5 = vector.extract_strided_slice %0 {offsets = [0, 0], sizes = [8, 1], strides = [1, 1]} : vector<8x4xf32> to vector<8x1xf32>
    %6 = vector.extract_strided_slice %2 {offsets = [0, 0], sizes = [1, 32], strides = [1, 1]} : vector<4x32xf32> to vector<1x32xf32>
    %7 = vector.broadcast %5 : vector<8x1xf32> to vector<8x32xf32>
    %8 = vector.broadcast %6 : vector<1x32xf32> to vector<8x32xf32>
    %9 = arith.mulf %7, %8 : vector<8x32xf32>
    %10 = arith.addf %4, %9 : vector<8x32xf32>
    %11 = vector.extract_strided_slice %0 {offsets = [0, 1], sizes = [8, 1], strides = [1, 1]} : vector<8x4xf32> to vector<8x1xf32>
    %12 = vector.extract_strided_slice %2 {offsets = [1, 0], sizes = [1, 32], strides = [1, 1]} : vector<4x32xf32> to vector<1x32xf32>
    %13 = vector.broadcast %11 : vector<8x1xf32> to vector<8x32xf32>
    %14 = vector.broadcast %12 : vector<1x32xf32> to vector<8x32xf32>
    %15 = arith.mulf %13, %14 : vector<8x32xf32>
    %16 = arith.addf %10, %15 : vector<8x32xf32>
    %17 = vector.extract_strided_slice %0 {offsets = [0, 2], sizes = [8, 1], strides = [1, 1]} : vector<8x4xf32> to vector<8x1xf32>
    %18 = vector.extract_strided_slice %2 {offsets = [2, 0], sizes = [1, 32], strides = [1, 1]} : vector<4x32xf32> to vector<1x32xf32>
    %19 = vector.broadcast %17 : vector<8x1xf32> to vector<8x32xf32>
    %20 = vector.broadcast %18 : vector<1x32xf32> to vector<8x32xf32>
    %21 = arith.mulf %19, %20 : vector<8x32xf32>
    %22 = arith.addf %16, %21 : vector<8x32xf32>
    %23 = vector.extract_strided_slice %0 {offsets = [0, 3], sizes = [8, 1], strides = [1, 1]} : vector<8x4xf32> to vector<8x1xf32>
    %24 = vector.extract_strided_slice %2 {offsets = [3, 0], sizes = [1, 32], strides = [1, 1]} : vector<4x32xf32> to vector<1x32xf32>
    %25 = vector.broadcast %23 : vector<8x1xf32> to vector<8x32xf32>
    %26 = vector.broadcast %24 : vector<1x32xf32> to vector<8x32xf32>
    %27 = arith.mulf %25, %26 : vector<8x32xf32>
    %28 = arith.addf %22, %27 : vector<8x32xf32>
    %cst = arith.constant 0.000000e+00 : f32
    %29 = vector.broadcast %cst : f32 to vector<8x32xf32>
    %30 = arith.maximumf %28, %29 : vector<8x32xf32>
    %c0_5 = arith.constant 0 : index
    %c0_6 = arith.constant 0 : index
    %31 = vector.load %arg4[%c0_5, %c0_6] : memref<32x32xf32, #tpu.memory_space<vmem>>, vector<32x32xf32>
    %cst_7 = arith.constant dense<0.000000e+00> : vector<8x32xf32>
    %32 = tpu.matmul %30, %31, %cst_7 {dimension_numbers = #tpu.dot_dimension_numbers<[1], [0], [0], [1], [0, 0, 1, 1], [], []>} : vector<8x32xf32>, vector<32x32xf32>, vector<8x32xf32> -> vector<8x32xf32>
    %c0_8 = arith.constant 0 : index
    %c0_9 = arith.constant 0 : index
    %33 = vector.load %arg5[%c0_8, %c0_9] : memref<1x32xf32, #tpu.memory_space<vmem>>, vector<1x32xf32>
    %34 = vector.broadcast %33 : vector<1x32xf32> to vector<8x32xf32>
    %35 = arith.addf %32, %34 : vector<8x32xf32>
    %cst_10 = arith.constant 0.000000e+00 : f32
    %36 = vector.broadcast %cst_10 : f32 to vector<8x32xf32>
    %37 = arith.maximumf %35, %36 : vector<8x32xf32>
    %c0_11 = arith.constant 0 : index
    %c0_12 = arith.constant 0 : index
    %38 = vector.load %arg6[%c0_11, %c0_12] : memref<32x4xf32, #tpu.memory_space<vmem>>, vector<32x4xf32>
    %cst_13 = arith.constant dense<0.000000e+00> : vector<8x4xf32>
    %39 = tpu.matmul %37, %38, %cst_13 {dimension_numbers = #tpu.dot_dimension_numbers<[1], [0], [0], [1], [0, 0, 1, 1], [], []>} : vector<8x32xf32>, vector<32x4xf32>, vector<8x4xf32> -> vector<8x4xf32>
    %c0_14 = arith.constant 0 : index
    %c0_15 = arith.constant 0 : index
    %40 = vector.load %arg7[%c0_14, %c0_15] : memref<1x4xf32, #tpu.memory_space<vmem>>, vector<1x4xf32>
    %41 = vector.broadcast %40 : vector<1x4xf32> to vector<8x4xf32>
    %42 = arith.addf %39, %41 : vector<8x4xf32>
    %c0_16 = arith.constant 0 : index
    %c0_17 = arith.constant 0 : index
    %43 = vector.load %arg8[%c0_16, %c0_17] : memref<8x4xf32, #tpu.memory_space<vmem>>, vector<8x4xf32>
    tpu.vector_store %arg8[%c0_16, %c0_17], %42 {strides = array<i32>} : memref<8x4xf32, #tpu.memory_space<vmem>>, vector<8x4xf32>,
    return
  }
  func.func @transform_0(%arg0: i32) -> (i32, i32) {
    %c0_i32 = arith.constant 0 : i32
    %c0_i32_0 = arith.constant 0 : i32
    return %arg0, %c0_i32 : i32, i32
  }
  func.func @transform_1(%arg0: i32) -> (i32, i32) {
    %c0_i32 = arith.constant 0 : i32
    %c0_i32_0 = arith.constant 0 : i32
    %c0_i32_1 = arith.constant 0 : i32
    return %c0_i32, %c0_i32_0 : i32, i32
  }
  func.func @transform_2(%arg0: i32) -> (i32, i32) {
    %c0_i32 = arith.constant 0 : i32
    %c0_i32_0 = arith.constant 0 : i32
    %c0_i32_1 = arith.constant 0 : i32
    return %c0_i32, %c0_i32_0 : i32, i32
  }
  func.func @transform_3(%arg0: i32) -> (i32, i32) {
    %c0_i32 = arith.constant 0 : i32
    %c0_i32_0 = arith.constant 0 : i32
    %c0_i32_1 = arith.constant 0 : i32
    return %c0_i32, %c0_i32_0 : i32, i32
  }
  func.func @transform_4(%arg0: i32) -> (i32, i32) {
    %c0_i32 = arith.constant 0 : i32
    %c0_i32_0 = arith.constant 0 : i32
    %c0_i32_1 = arith.constant 0 : i32
    return %c0_i32, %c0_i32_0 : i32, i32
  }
  func.func @transform_5(%arg0: i32) -> (i32, i32) {
    %c0_i32 = arith.constant 0 : i32
    %c0_i32_0 = arith.constant 0 : i32
    %c0_i32_1 = arith.constant 0 : i32
    return %c0_i32, %c0_i32_0 : i32, i32
  }
  func.func @transform_6(%arg0: i32) -> (i32, i32) {
    %c0_i32 = arith.constant 0 : i32
    %c0_i32_0 = arith.constant 0 : i32
    %c0_i32_1 = arith.constant 0 : i32
    return %c0_i32, %c0_i32_0 : i32, i32
  }
  func.func @transform_7(%arg0: i32) -> (i32, i32) {
    %c0_i32 = arith.constant 0 : i32
    %c0_i32_0 = arith.constant 0 : i32
    return %arg0, %c0_i32 : i32, i32
  }
}

</mosaic_0001>

<bundles_post_ra>
// kernel: tpu_custom_call.1
= control target key start
LH: loop header
LB: loop body
LE: loop exit
PB: predicated region body
PF: predicated region fallthrough
CT: control target
= control target key end

     0   :  { %v314_v0 = vmov 0   ;;  %v315_v2 = vmov 2   ;;  %v316_v3 = vmov 1   ;;  %v317_v4 = vmov 3   ;;  %s403_s0 = inlined_call_operand.vmem [shape: f32[8,4], index: 0, kind: input, shape index: {}]   ;;  %s404_s3 = inlined_call_operand.vmem [shape: f32[32,32], index: 3, kind: input, shape index: {}]   ;;  %s405_s5 = inlined_call_operand.vmem [shape: f32[32,4], index: 5, kind: input, shape index: {}]   ;;  %s406_s1 = inlined_call_operand.vmem [shape: f32[4,32], index: 1, kind: input, shape index: {}]   ;;  %s407_s2 = inlined_call_operand.vmem [shape: f32[1,32], index: 2, kind: input, shape index: {}]   ;;  %s408_s4 = inlined_call_operand.vmem [shape: f32[1,32], index: 4, kind: input, shape index: {}]   ;;  %s409_s6 = inlined_call_operand.vmem [shape: f32[1,4], index: 6, kind: input, shape index: {}]   ;;  %s410_s7 = inlined_call_operand.vmem [shape: f32[8,4], index: 7, kind: output, shape index: {}]  }
   0x1   :  { %309 = vset.pattern.permute.xlu0 %v314_v0  ;;  %v26_v1 = vld [vmem:[%s403_s0] sm:$0xff]  ;;  %311 = vset.pattern.permute.xlu1 %v315_v2  ;;  %v78_v6 = vld [vmem:[%s404_s3 + $0x8] sm:$0xff]  ;;  %v318_v8 = vmov 0.0|0.0   ;;  %v79_v9 = vld [vmem:[%s404_s3 + $0x10] sm:$0xff]  ;;  %vm319_vm0 = vmmov 0   ;;  %v320_v12 = vmov 0.0   ;;  %v40_v16 = vlaneseq }
   0x2   :  { %37 = vperm.xlu0 %309, %v26_v1   ;;  %57 = vperm.xlu1 %311, %v26_v1   ;;  %v77_v5 = vld [vmem:[%s404_s3] sm:$0xff]  ;;  %v80_v10 = vld [vmem:[%s404_s3 + $0x18] sm:$0xff]  ;;  %v164_v14 = vld [vmem:[%s405_s5 + $0x8] sm:$0xff]  ;;  %vm88_vm1 = vcmask 261120   ;;  %vm247_vm2 = vcmask 31744  }
   0x3   :  { %v291_v7 = vpack.c.bf16 %v78_v6, %v77_v5  ;;  %290 = vmatprep.subr.bf16.mxu0 %v318_v8  ;;  %296 = vmatprep.subr.bf16.mxu1 %v318_v8  ;;  %v294_v11 = vpack.c.bf16 %v80_v10, %v79_v9  ;;  %v163_v13 = vld [vmem:[%s405_s5] sm:$0xff]  ;;  %v41_v17 = vshrl.u32 %v40_v16, 7  ;;  %v165_v41 = vld [vmem:[%s405_s5 + $0x10] sm:$0xff]  ;;  %v166_v42 = vld [vmem:[%s405_s5 + $0x18] sm:$0xff] }
   0x4   :  { %276 = vmatprep.mubr.msk.f32.mxu0 %vm319_vm0, %v320_v12  ;;  %287 = vmatprep.mubr.msk.f32.mxu1 %vm319_vm0, %v320_v12  ;;  %v297_v15 = vpack.c.bf16 %v164_v14, %v163_v13  ;;  %v28_v19 = vld [vmem:[%s406_s1] sm:$0xf]  ;;  %v300_v43 = vpack.c.bf16 %v166_v42, %v165_v41 }
   0x5   :  { %292 = vmatpush3.bf16.msra.mxu0 %v291_v7  ;;  %v42_v18 = vsub.s32 0, %v41_v17  ;;  %v52_v21 = vsub.s32 1, %v41_v17  ;;  %v62_v23 = vsub.s32 2, %v41_v17  ;;  %v72_v25 = vsub.s32 3, %v41_v17  ;;  %v253_v28 = vld [vmem:[%s407_s2] ss:$0 sm:$0xff] }
   0x6   :  { %310 = vset.pattern.permute.xlu0 %v316_v3  ;;  %312 = vset.pattern.permute.xlu1 %v317_v4  ;;  %v254_v44 = vld [vmem:[%s408_s4] ss:$0 sm:$0xff] }
   0x7   :  { %47 = vperm.xlu0 %310, %v26_v1   ;;  %67 = vperm.xlu1 %312, %v26_v1   ;;  %v43_v20 = vrot.slane %v28_v19, %v42_v18  ;;  %v53_v27 = vrot.slane %v28_v19, %v52_v21  ;;  %v63_v29 = vrot.slane %v28_v19, %v62_v23  ;;  %v256_v49 = vld [vmem:[%s409_s6] ss:$0 sm:$0xff] }
   0x8   :  { %293 = vmatprep.subr.bf16.mxu0 %v318_v8  ;;  %298 = vmatpush3.bf16.msra.mxu1 %v297_v15  ;;  %v73_v30 = vrot.slane %v28_v19, %v72_v25 }
   0x9   :  { %295 = vmatpush3.bf16.msra.mxu0 %v294_v11  ;;  %299 = vmatprep.subr.bf16.mxu1 %v318_v8 }
   0xb   :  { %313 = vset.pattern.permute.xlu0 %v317_v4 }
   0xc   :  { %301 = vmatpush3.bf16.msra.mxu1 %v300_v43 }
  0x81   :  { %v38_v22 = vpop.permute.xlu0 %37  ;;  %v58_v24 = vpop.permute.xlu1 %57 }
  0x82   :  { %v44_v26 = vmul.f32 %v43_v20, %v38_v22  ;;  %v64_v35 = vmul.f32 %v63_v29, %v58_v24 }
  0x84   :  { %v45_v33 = vadd.f32 %v253_v28, %v44_v26 }
  0x86   :  { %v48_v31 = vpop.permute.xlu0 %47  ;;  %v68_v32 = vpop.permute.xlu1 %67 }
  0x87   :  { %v54_v34 = vmul.f32 %v53_v27, %v48_v31  ;;  %v74_v37 = vmul.f32 %v73_v30, %v68_v32 }
  0x89   :  { %v55_v36 = vadd.f32 %v54_v34, %v45_v33 }
  0x8b   :  { %v65_v38 = vadd.f32 %v64_v35, %v55_v36 }
  0x8d   :  { %v75_v39 = vadd.f32 %v74_v37, %v65_v38 }
  0x8f   :  { %v76_v40 = vmax.f32 %v75_v39, 0.0 }
  0x91   :  { %277 = vmatmul.mubr.msk.f32.vlgmr.msra.gmra.mrb[0].mxu0 %vm88_vm1, %v76_v40 }
 0x164   :  { %v158_v45 = vpop.f32.mrb[0].mxu0 }
 0x165   :  { %v159_v46 = vadd.f32 %v254_v44, %v158_v45  ;;  %v278_v47 = vpop.f32.mrb[1].mxu0 }
 0x167   :  { %v162_v48 = vmax.f32 %v159_v46, 0.0 }
 0x169   :  { %288 = vmatmul.mubr.msk.f32.vlgmr.msra.gmra.mrb[0].mxu1 %vm88_vm1, %v162_v48 }
 0x23c   :  { %v243_v50 = vpop.f32.mrb[0].mxu1 }
 0x23d   :  { %v244_v51 = vadd.f32 %v256_v49, %v243_v50  ;;  %v289_v52 = vpop.f32.mrb[1].mxu1 }
 0x23f   :  { %248 = vst.msk [vmem:[%s410_s7] sm:$0xff] %vm247_vm2, %v244_v51 }

</bundles_post_ra>
